<compile_context>
chip_gen: v7x
topology: tpu7x:2x2x1
jax: 0.10.0
libtpu: 0.0.40
codegen_flags: <defaults>
</compile_context>

<pallas_src>
import functools

import jax
import jax.numpy as jnp
from jax import lax
from jax.experimental import pallas as pl
from jax.experimental.pallas import tpu as pltpu


def _ce_sum_kernel(lbl_ref, logits_ref, acc_ref, *, npix):
    """One (batch b, pixel super-chunk s, pixel-tile p) grid step.

    lbl_ref:    (1, 1, TP)    int labels
    logits_ref: (1, C, TP)    logits (input dtype), classes on sublanes, pixels on lanes
    acc_ref:    (1, 1, 1, TP) f32 per-lane partial sums of per-pixel CE, resident
                across the pixel grid axis for a fixed (b, s).
    """
    s = pl.program_id(1)
    p = pl.program_id(2)

    @pl.when(p == 0)
    def _():
        acc_ref[...] = jnp.zeros_like(acc_ref)

    logits = logits_ref[0].astype(jnp.float32)             # (C, TP)
    lbl = lbl_ref[0].astype(jnp.int32)                      # (1, TP)
    c, tp = logits.shape

    c_ids = lax.broadcasted_iota(jnp.int32, (c, tp), 0)     # (C, TP)
    onehot = c_ids == lbl                                   # (C, TP)
    # ignore_index / out-of-range labels contribute zero loss (still counted
    # in the mean's denominator, matching reduction='none' + mean()).
    lbl_ok = jnp.logical_and(lbl >= 0, lbl < c)              # (1, TP)

    def pixel_ce(x):
        # x: (C, TP) f32 logits -> per-pixel CE (1, TP), numerically stable.
        m = jnp.max(x, axis=0, keepdims=True)
        se = jnp.sum(jnp.exp(x - m), axis=0, keepdims=True)
        lse = m + jnp.log(se)
        true_logit = jnp.sum(jnp.where(onehot, x, 0.0), axis=0, keepdims=True)
        return jnp.where(lbl_ok, lse - true_logit, 0.0)

    if npix % tp == 0:
        # No overhanging tile anywhere: single unmasked fast path.
        acc_ref[...] += pixel_ce(logits)[None, None]
    else:
        g = s * pl.num_programs(2) + p                       # global pixel-tile index
        tail_idx = npix // tp                                 # the only partial tile

        @pl.when(g != tail_idx)
        def _interior():
            acc_ref[...] += pixel_ce(logits)[None, None]

        @pl.when(g == tail_idx)
        def _tail():
            pix = g * tp + lax.broadcasted_iota(jnp.int32, (1, tp), 1)
            valid = pix < npix                                # (1, TP)
            x = jnp.where(valid, logits, 0.0)                 # sanitize undefined lanes
            acc_ref[...] += jnp.where(valid, pixel_ce(x), 0.0)[None, None]


def _round_up(x, m):
    return (x + m - 1) // m * m


def _choose_tile(npix, c, itemsize, *, target_bytes=2 << 20, max_bytes=4 << 20):
    """Pixel tile: multiple of 128, logits block ~target_bytes, capped for VMEM."""
    tp = _round_up(max(target_bytes // (c * itemsize), 1), 128)
    tp = max(tp, 2048)                                       # amortize ~0.35us/step
    tp_cap = max((max_bytes // (c * itemsize)) // 128 * 128, 128)
    tp = min(tp, tp_cap)                                     # keep double-buffered block in VMEM
    tp = min(tp, _round_up(npix, 128))                       # don't exceed the array
    return tp


def segmentation_cross_entropy_loss(output, labels, *, target_block_bytes=2 << 20,
                                    return_masks_probs=True):
    """Mirrors SegmentationCrossEntropyLoss.forward; output/labels are tuples."""
    out = output[0]                       # (B, C, H, W) logits
    true_masks = labels[0]                # (B, H, W)    int labels
    B, C, H, W = out.shape
    npix = H * W

    logits = out.reshape(B, C, npix)                         # free row-major reshape
    lbl = true_masks.reshape(B, 1, npix)
    if lbl.dtype != jnp.int32:                               # avoid extra HBM pass if already i32
        lbl = lbl.astype(jnp.int32)

    itemsize = jnp.dtype(logits.dtype).itemsize
    tp = _choose_tile(npix, C, itemsize, target_bytes=target_block_bytes)
    n_blocks = (npix + tp - 1) // tp

    # Second parallel axis over pixel super-chunks keeps both v7x TensorCores
    # busy when B == 1.  Only split when the block count divides evenly so no
    # grid step ever maps to a fully out-of-range pixel tile.
    n_super = 2 if (B == 1 and n_blocks >= 2 and n_blocks % 2 == 0) else 1
    n_inner = n_blocks // n_super

    partial = pl.pallas_call(
        functools.partial(_ce_sum_kernel, npix=npix),
        out_shape=jax.ShapeDtypeStruct((B, n_super, 1, tp), jnp.float32),
        grid_spec=pltpu.PrefetchScalarGridSpec(
            num_scalar_prefetch=0,
            grid=(B, n_super, n_inner),
            in_specs=[
                pl.BlockSpec((1, 1, tp), lambda b, s, p: (b, 0, s * n_inner + p)),
                pl.BlockSpec((1, C, tp), lambda b, s, p: (b, 0, s * n_inner + p)),
            ],
            out_specs=pl.BlockSpec((1, 1, 1, tp), lambda b, s, p: (b, s, 0, 0)),
        ),
        compiler_params=pltpu.CompilerParams(
            dimension_semantics=("parallel", "parallel", "arbitrary"),
            vmem_limit_bytes=32 * 1024 * 1024),
    )(lbl, logits)

    # Single cross-lane reduction + mean, done once outside the grid loop.
    loss = jnp.sum(partial) / (B * npix)

    masks_probs = None
    if return_masks_probs:
        # Pure layout permute/reshape of the input (the module returns it); it
        # re-reads/re-writes the whole logits tensor in HBM and the loss kernel
        # never consumes it, so it is skippable via return_masks_probs=False.
        # TODO(synk): fuse the NHWC writeback as a second pallas output (or emit
        # the native (B, C, npix) layout) when the caller can accept it.
        masks_probs = jnp.transpose(out, (0, 2, 3, 1)).reshape(B * npix, C)
    return loss, masks_probs


if __name__ == "__main__":
    key = jax.random.PRNGKey(0)
    k1, k2 = jax.random.split(key)
    B, C, H, W = 2, 4, 16, 16
    out = jax.random.normal(k1, (B, C, H, W), dtype=jnp.float32)
    true_masks = jax.random.randint(k2, (B, H, W), 0, C, dtype=jnp.int32)

    loss, masks_probs = segmentation_cross_entropy_loss((out,), (true_masks,))
    loss = jax.block_until_ready(loss)
    masks_probs = jax.block_until_ready(masks_probs)

    # Pure-JAX reference: nn.CrossEntropyLoss(reduction='none') then mean().
    flat = jnp.transpose(out, (0, 2, 3, 1)).reshape(-1, C).astype(jnp.float32)
    t = true_masks.reshape(-1)
    lse_ref = jax.nn.logsumexp(flat, axis=1)
    ref_loss = jnp.mean(lse_ref - flat[jnp.arange(t.shape[0]), t])

    assert masks_probs.shape == (B * H * W, C)
    assert jnp.allclose(masks_probs, flat), "masks_probs mismatch"
    assert jnp.allclose(loss, ref_loss, atol=1e-5, rtol=1e-5), (loss, ref_loss)
    print("KERNEL_OK")
</pallas_src>

<mosaic_0001>
module attributes {stable_mosaic.version = 11 : i64} {
  func.func @_ce_sum_kernel(%arg0: i32, %arg1: i32, %arg2: i32, %arg3: memref<1x1x256xi32, #tpu.memory_space<vmem>>, %arg4: memref<1x4x256xf32, #tpu.memory_space<vmem>>, %arg5: memref<1x1x1x256xf32, #tpu.memory_space<vmem>>) attributes {dimension_semantics = [#tpu.dimension_semantics<parallel>, #tpu.dimension_semantics<parallel>, #tpu.dimension_semantics<arbitrary>], iteration_bounds = array<i64: 2, 1, 1>, scalar_prefetch = 0 : i64, scratch_operands = 0 : i64, tpu.core_type = #tpu.core_type<tc>, window_params = [{transform_indices = @transform_0, window_bounds = array<i64: 1, 1, 256>}, {transform_indices = @transform_1, window_bounds = array<i64: 1, 4, 256>}, {transform_indices = @transform_2, window_bounds = array<i64: 1, 1, 1, 256>}]} {
    %c0_i32 = arith.constant 0 : i32
    %0 = arith.cmpi eq, %arg2, %c0_i32 : i32
    %1 = arith.extui %0 : i1 to i32
    %c0_i32_0 = arith.constant 0 : i32
    %2 = arith.cmpi ne, %1, %c0_i32_0 : i32
    scf.if %2 {
      %cst_19 = arith.constant 0.000000e+00 : f32
      %35 = vector.broadcast %cst_19 : f32 to vector<1x1x1x256xf32>
      %c0_20 = arith.constant 0 : index
      %c0_21 = arith.constant 0 : index
      %c0_22 = arith.constant 0 : index
      %c0_23 = arith.constant 0 : index
      %36 = vector.load %arg5[%c0_20, %c0_21, %c0_22, %c0_23] : memref<1x1x1x256xf32, #tpu.memory_space<vmem>>, vector<1x1x1x256xf32>
      tpu.vector_store %arg5[%c0_20, %c0_21, %c0_22, %c0_23], %35 {strides = array<i32>} : memref<1x1x1x256xf32, #tpu.memory_space<vmem>>, vector<1x1x1x256xf32>,
    } else {
    }
    %c0 = arith.constant 0 : index
    %c0_1 = arith.constant 0 : index
    %c0_2 = arith.constant 0 : index
    %3 = vector.load %arg4[%c0, %c0_1, %c0_2] : memref<1x4x256xf32, #tpu.memory_space<vmem>>, vector<1x4x256xf32>
    %4 = vector.shape_cast %3 : vector<1x4x256xf32> to vector<4x256xf32>
    %c0_3 = arith.constant 0 : index
    %c0_4 = arith.constant 0 : index
    %c0_5 = arith.constant 0 : index
    %5 = vector.load %arg3[%c0_3, %c0_4, %c0_5] : memref<1x1x256xi32, #tpu.memory_space<vmem>>, vector<1x1x256xi32>
    %6 = vector.shape_cast %5 : vector<1x1x256xi32> to vector<1x256xi32>
    %7 = tpu.iota {dimensions = array<i32: 0>} : vector<4x256xi32>
    %8 = vector.broadcast %6 : vector<1x256xi32> to vector<4x256xi32>
    %9 = arith.cmpi eq, %7, %8 : vector<4x256xi32>
    %c0_i32_6 = arith.constant 0 : i32
    %10 = vector.broadcast %c0_i32_6 : i32 to vector<1x256xi32>
    %11 = arith.cmpi sge, %6, %10 : vector<1x256xi32>
    %c4_i32 = arith.constant 4 : i32
    %12 = vector.broadcast %c4_i32 : i32 to vector<1x256xi32>
    %13 = arith.cmpi slt, %6, %12 : vector<1x256xi32>
    %14 = arith.andi %11, %13 : vector<1x256xi1>
    %c0_7 = arith.constant 0 : index
    %c0_8 = arith.constant 0 : index
    %c0_9 = arith.constant 0 : index
    %c0_10 = arith.constant 0 : index
    %15 = vector.load %arg5[%c0_7, %c0_8, %c0_9, %c0_10] : memref<1x1x1x256xf32, #tpu.memory_space<vmem>>, vector<1x1x1x256xf32>
    %cst = arith.constant dense<0xFF800000> : vector<256xf32>
    %16 = vector.multi_reduction <maximumf>, %4, %cst [0] : vector<4x256xf32> to vector<256xf32>
    %17 = vector.shape_cast %16 : vector<256xf32> to vector<1x256xf32>
    %18 = vector.broadcast %17 : vector<1x256xf32> to vector<4x256xf32>
    %19 = arith.subf %4, %18 : vector<4x256xf32>
    %20 = math.exp %19 : vector<4x256xf32>
    %cst_11 = arith.constant dense<0.000000e+00> : vector<256xf32>
    %21 = vector.multi_reduction <add>, %20, %cst_11 [0] : vector<4x256xf32> to vector<256xf32>
    %22 = vector.shape_cast %21 : vector<256xf32> to vector<1x256xf32>
    %23 = math.log %22 : vector<1x256xf32>
    %24 = arith.addf %17, %23 : vector<1x256xf32>
    %cst_12 = arith.constant 0.000000e+00 : f32
    %25 = vector.broadcast %cst_12 : f32 to vector<4x256xf32>
    %26 = arith.select %9, %4, %25 : vector<4x256xi1>, vector<4x256xf32>
    %cst_13 = arith.constant dense<0.000000e+00> : vector<256xf32>
    %27 = vector.multi_reduction <add>, %26, %cst_13 [0] : vector<4x256xf32> to vector<256xf32>
    %28 = vector.shape_cast %27 : vector<256xf32> to vector<1x256xf32>
    %29 = arith.subf %24, %28 : vector<1x256xf32>
    %cst_14 = arith.constant 0.000000e+00 : f32
    %30 = vector.broadcast %cst_14 : f32 to vector<1x256xf32>
    %31 = arith.select %14, %29, %30 : vector<1x256xi1>, vector<1x256xf32>
    %32 = vector.shape_cast %31 : vector<1x256xf32> to vector<1x1x1x256xf32>
    %33 = arith.addf %15, %32 : vector<1x1x1x256xf32>
    %c0_15 = arith.constant 0 : index
    %c0_16 = arith.constant 0 : index
    %c0_17 = arith.constant 0 : index
    %c0_18 = arith.constant 0 : index
    %34 = vector.load %arg5[%c0_15, %c0_16, %c0_17, %c0_18] : memref<1x1x1x256xf32, #tpu.memory_space<vmem>>, vector<1x1x1x256xf32>
    tpu.vector_store %arg5[%c0_15, %c0_16, %c0_17, %c0_18], %33 {strides = array<i32>} : memref<1x1x1x256xf32, #tpu.memory_space<vmem>>, vector<1x1x1x256xf32>,
    return
  }
  func.func @transform_0(%arg0: i32, %arg1: i32, %arg2: i32) -> (i32, i32, i32) {
    %c1_i32 = arith.constant 1 : i32
    %0 = arith.muli %arg1, %c1_i32 : i32
    %1 = arith.addi %0, %arg2 : i32
    %c0_i32 = arith.constant 0 : i32
    %c0_i32_0 = arith.constant 0 : i32
    return %arg0, %c0_i32, %1 : i32, i32, i32
  }
  func.func @transform_1(%arg0: i32, %arg1: i32, %arg2: i32) -> (i32, i32, i32) {
    %c1_i32 = arith.constant 1 : i32
    %0 = arith.muli %arg1, %c1_i32 : i32
    %1 = arith.addi %0, %arg2 : i32
    %c0_i32 = arith.constant 0 : i32
    %c0_i32_0 = arith.constant 0 : i32
    return %arg0, %c0_i32, %1 : i32, i32, i32
  }
  func.func @transform_2(%arg0: i32, %arg1: i32, %arg2: i32) -> (i32, i32, i32, i32) {
    %c0_i32 = arith.constant 0 : i32
    %c0_i32_0 = arith.constant 0 : i32
    %c0_i32_1 = arith.constant 0 : i32
    return %arg0, %arg1, %c0_i32, %c0_i32_0 : i32, i32, i32, i32
  }
}

</mosaic_0001>

<bundles_post_ra>
// kernel: tpu_custom_call.1
= control target key start
LH: loop header
LB: loop body
LE: loop exit
PB: predicated region body
PF: predicated region fallthrough
CT: control target
= control target key end

     0   :  { %7 = vsyncpa [#allocation3], 0  ;;  %s991_s0 = inlined_call_operand.hbm [shape: s32[2,1,256], index: 0, kind: input, shape index: {}]   ;;  %s992_s1 = inlined_call_operand.hbm [shape: f32[2,4,256], index: 1, kind: input, shape index: {}]   ;;  %s993_s2 = inlined_call_operand.hbm [shape: f32[2,1,1,256], index: 2, kind: output, shape index: {}]  }
   0x1   :  { %9 = vsyncpa [#allocation3 + $0x1], 0 }
   0x2   :  { %10 = vsyncpa [#allocation6], 0 }
   0x3   :  { %12 = vsyncpa [#allocation6 + $0x1], 0 }
   0x4   :  { %13 = vsyncpa [#allocation4], 0 }
   0x5   :  { %15 = vsyncpa [#allocation4 + $0x1], 0  ;;  %s753_s9 = smov 0   ;;  %s755_s10 = smov 0  }
   0x6   :  { %s757_s11 = smov 0   ;;  %s759_s12 = smov 0  }
   0x7   :  { %s761_s13 = smov 0   ;;  %s763_s14 = smov 0  }
   0x8 LB: > { %s487_s15 = sadd.s32 4294967295, %s731_s14   ;;  %s488_s16 = sadd.s32 4294967294, %s731_s14   ;;  %s731_s14 = sphi %s763_s14, %s21_s14   ;;  %s727_s13 = sphi %s761_s13, %s1015_s13   ;;  %s723_s12 = sphi %s759_s12, %s1014_s12   ;;  %s719_s11 = sphi %s757_s11, %s1013_s11   ;;  %s715_s10 = sphi %s755_s10, %s1012_s10   ;;  %s711_s9 = sphi %s753_s9, %s1011_s9  }
   0x9   : > { %s40_s17 = sadd.s32 1, %s727_s13  ;;  %s51_s18 = sadd.s32 1, %s719_s11 }
   0xa   : > { %p42_p0 = scmp.ge.s32.totalorder %s40_s17, 2  ;;  %p58_p1 = scmp.ne.s32.totalorder %s719_s11, %s715_s10 }
   0xb   : > { %p59_p2 = scmp.eq.s32.totalorder %s731_s14, 0  ;;  %p64_p3 = scmp.ne.s32.totalorder %s715_s10, %s711_s9 }
   0xc   : > { %s1017_s17 = smov (%p42_p0, %s40_s17), 0  ;;  %p65_p5 = scmp.eq.s32.totalorder %s487_s15, 0 }
   0xd   : > { %p794_p4 = por %p59_p2, %p58_p1  ;;  %s46_s20 = ssub.s32 %s727_s13, %s1017_s17 }
   0xe   : > { %p120_p6 = scmp.eq.s32.totalorder %s487_s15, 1  ;;  %p49_p7 = scmp.eq.s32.totalorder %s46_s20, 0 }
   0xf   : > { %p800_p8 = por %p65_p5, %p64_p3  ;;  %p126_p10 = scmp.eq.s32.totalorder %s488_s16, 1 }
  0x10   : > { %p804_p9 = por %p120_p6, %p58_p1  ;;  %p526_p13 = scmp.lt.s32.totalorder %s731_s14, 2 }
  0x11   : > { %s997_s21 = scalar_select %p800_p8, 1, 0 }
  0x12   : > { %s998_s22 = scalar_select %p804_p9, 1, 0 }
  0x13   : > { %s809_s23 = scalar_select %p49_p7, %s719_s11, %s51_s18  }
  0x14   : > { %p811_p11 = por %p126_p10, %p64_p3  ;;  %s818_s25 = sand.u32 1, %s719_s11  }
  0x15   : > { %s491_s26 = sshll.u32 %s818_s25, 1  ;;  %s506_s27 = sshll.u32 %s727_s13, 5 }
  0x16   : > { %s999_s24 = scalar_select %p811_p11, 1, 0 }
  0x17   : > { %s825_s30 = scalar_lea.hbm %s991_s0, %s506_s27  ;;  %s150_s3 = scalar_lea.vmem [#allocation2], %s491_s26 }
  0x18   : > { %s161_s4 = sshll.u32 %s150_s3, 4  ;;  %p831_p0 = pnand %p526_p13, %p794_p4  ;;  %s827_s4 = int_to_ptr.vmem [resolvable:$true] %s161_s4 }
  0x19   : > { %s147_s6 = scalar_lea.sflag [#allocation3], %s818_s25  ;;  %s585_s7 = scalar_lea.hbm %s825_s30, 32 }
  0x1a   : > { %p586_p3 = scmp.ne.s32.totalorder %s825_s30, %s585_s7  ;;  %p587_p5 = pneg %p831_p0 }
  0x1b   : > { %s590_s16 = scalar_lea.hbm %s991_s0, 64  ;;  %p591_p4 = scmp.lt.u32.totalorder %s825_s30, %s991_s0 }
  0x1c   : > { %p588_p6 = pnand %p587_p5, %p586_p3  ;;  %p592_p10 = scmp.lt.u32.totalorder %s590_s16, %s585_s7 }
  0x1d   : > { %p594_p12 = scmp.lt.u32.totalorder %s585_s7, %s825_s30 }
  0x1e   : > { %p589_p7 = pneg %p588_p6  ;;  %p593_p13 = por %p592_p10, %p591_p4 }
  0x20   : > { %p595_p1 = por %p594_p12, %p593_p13 }
  0x22   : > { %p596_p2 = pnand %p595_p1, %p589_p7 }
  0x24   : > { %599 = shalt.err (!%p596_p2)
}
  0x25   : > { %s600_s20 = scalar_lea.vmem %s827_s4, 32  ;;  %s733_s26 = smov [#allocation2]  }
  0x26   : > { %p601_p3 = scmp.ne.s32.totalorder %s827_s4, %s600_s20  ;;  %s605_s27 = sshll.u32 %s733_s26, 4  ;;  %s606_s27 = int_to_ptr.vmem [resolvable:$false] %s605_s27 }
  0x27   : > { %s607_s28 = scalar_lea.vmem %s606_s27, 64  ;;  %p608_p9 = scmp.lt.s32.totalorder %s827_s4, %s606_s27 }
  0x28   : > { %p603_p6 = pnand %p601_p3, %p587_p5  ;;  %p609_p4 = scmp.lt.s32.totalorder %s607_s28, %s600_s20 }
  0x2a   : > { %p604_p11 = pneg %p603_p6  ;;  %p610_p10 = por %p609_p4, %p608_p9 }
  0x2c   : > { %p611_p12 = pnand %p610_p10, %p604_p11 }
  0x2e   : > { %614 = shalt.err (!%p611_p12)
}
  0x2f   : > { %518 = dma.hbm_to_vmem [thread:$0]  (!%p831_p0), %s825_s30, 32, %s827_s4, %s147_s6  }
  0x30   : > { %p1001_p1 = scmp.lt.s32.totalorder %s731_s14, 3  ;;  %p1002_p2 = scmp.ge.s32.totalorder %s731_s14, 1 }
  0x31   : > { %s494_s3 = sshll.u32 %s818_s25, 3  ;;  %s507_s7 = sshll.u32 %s727_s13, 7 }
  0x32   : > { %p867_p7 = pnand %p1002_p2, %p1001_p1  ;;  %s876_s16 = scalar_lea.hbm %s992_s1, %s507_s7 }
  0x33   : > { %s172_s18 = scalar_lea.vmem [#allocation5], %s494_s3  ;;  %s169_s30 = scalar_lea.sflag [#allocation6], %s818_s25 }
  0x34   : > { %s1003_s29 = scalar_select %p867_p7, 1, 0 }
  0x35   : > { %s183_s19 = sshll.u32 %s172_s18, 4  ;;  %s615_s4 = scalar_lea.hbm %s876_s16, 128  ;;  %s184_s19 = int_to_ptr.vmem [resolvable:$true] %s183_s19 }
  0x36   : > { %p616_p9 = scmp.ne.s32.totalorder %s876_s16, %s615_s4  ;;  %s620_s26 = scalar_lea.hbm %s992_s1, 256 }
  0x37   : > { %p621_p3 = scmp.lt.u32.totalorder %s876_s16, %s992_s1  ;;  %p622_p6 = scmp.lt.u32.totalorder %s620_s26, %s615_s4 }
  0x38   : > { %p618_p11 = pnand %p616_p9, %p587_p5  ;;  %p624_p10 = scmp.lt.u32.totalorder %s615_s4, %s876_s16 }
  0x39   : > { %p623_p4 = por %p622_p6, %p621_p3 }
  0x3a   : > { %p619_p13 = pneg %p618_p11 }
  0x3b   : > { %p625_p12 = por %p624_p10, %p623_p4 }
  0x3d   : > { %p626_p1 = pnand %p625_p12, %p619_p13 }
  0x3f   : > { %629 = shalt.err (!%p626_p1)
}
  0x40   : > { %s630_s25 = scalar_lea.vmem %s184_s19, 128  ;;  %s734_s3 = smov [#allocation5]  }
  0x41   : > { %p631_p2 = scmp.ne.s32.totalorder %s184_s19, %s630_s25  ;;  %s635_s7 = sshll.u32 %s734_s3, 4  ;;  %s636_s7 = int_to_ptr.vmem [resolvable:$false] %s635_s7 }
  0x42   : > { %s637_s8 = scalar_lea.vmem %s636_s7, 256  ;;  %p638_p8 = scmp.lt.s32.totalorder %s184_s19, %s636_s7 }
  0x43   : > { %p633_p9 = pnand %p631_p2, %p587_p5  ;;  %p639_p7 = scmp.lt.s32.totalorder %s637_s8, %s630_s25 }
  0x45   : > { %p634_p11 = pneg %p633_p9  ;;  %p640_p3 = por %p639_p7, %p638_p8 }
  0x47   : > { %p641_p6 = pnand %p640_p3, %p634_p11 }
  0x49   : > { %644 = shalt.err (!%p641_p6)
}
  0x4a   : > { %521 = dma.hbm_to_vmem [thread:$0]  (!%p831_p0), %s876_s16, 128, %s184_s19, %s169_s30  }
  0x4b   : > { %p1004_p13 = scmp.ne.s32.totalorder %s1003_s29, 0 }
  0x4c   : > { %s901_s15 = sand.u32 (!%p1004_p13), 1, %s715_s10   ;;  %p1005_p8 = scmp.ne.s32.totalorder (!%p1004_p13), %s997_s21, 0 }
  0x4d   : > { %192 = sbr.rel (%p1004_p13) target bundleno = 176 (0xb0), region = 28  ;;  %s498_s18 = sshll.u32 (!%p1004_p13), %s901_s15, 1 }
  0x4e   : > { %s195_s4 = scalar_lea.sflag (!%p1004_p13), [#allocation3], %s901_s15  ;;  %s905_s6 = scalar_lea.vmem (!%p1004_p13), [#allocation2], %s498_s18 }
  0x54   : > { %698 = dma.done.wait (%p1005_p8), %s195_s4, 32  }
  0x55   : > { %700 = vsyncadd (%p1005_p8), %s195_s4, 4294967264  ;;  %s499_s5 = sshll.u32 %s901_s15, 3  ;;  %s204_s29 = scalar_lea.sflag [#allocation6], %s901_s15 }
  0x56   : > { %s207_s16 = scalar_lea.vmem [#allocation5], %s499_s5 }
  0x57   : > { %702 = dma.done.wait (%p1005_p8), %s204_s29, 128  }
  0x58   : > { %704 = vsyncadd (%p1005_p8), %s204_s29, 4294967168  ;;  %v241_v0 = vlaneseq  ;;  %s921_s19 = scalar_lea.vmem [#allocation7], %s498_s18  ;;  %v735_v2 = vmov 0.0   ;;  %vm267_vm1 = vcmask 1043456   ;;  %v246_v3 = vld [vmem:[%s207_s16] sm:$0xff]  ;;  %s508_s21 = sshll.u32 %s723_s12, 5 }
  0x59   : > { %v265_v4 = vcombine.high %v246_v3, %v246_v3  ;;  %v268_v5 = vsel %vm267_vm1, %v246_v3, -inf  ;;  %v247_v24 = vld [vmem:[%s905_s6] sm:$0x3]  ;;  %v736_v58 = vmov 1966171168   ;;  %s372_s30 = sshll.u32 %s921_s19, 4  ;;  %s939_s27 = scalar_lea.hbm %s993_s2, %s508_s21  ;;  %s941_s30 = int_to_ptr.vmem [resolvable:$true] %s372_s30 }
  0x5a   : > { %vm917_vm0 = vcmp.lt.s32.totalorder %v241_v0, 256  ;;  %v269_v6 = vrot.slane %v268_v5, 4  ;;  %v249_v19 = vshrl.u32 %v241_v0, 7  ;;  %v334_v59 = vunpack.c.l.s4 %v736_v58  ;;  %s356_s28 = scalar_lea.sflag [#allocation4], %s901_s15  ;;  %s645_s25 = scalar_lea.vmem %s941_s30, 32 }
  0x5b   : > { %245 = vst.msk [vmem:[%s921_s19] sm:$0x3] %vm917_vm0, %v735_v2  ;;  %v275_v7 = vsel %vm267_vm1, %v265_v4, -inf  ;;  %vm260_vm4 = vcmp.ge.s32.totalorder %v247_v24, 0  ;;  %vm261_vm5 = vcmp.lt.s32.totalorder %v247_v24, 4  ;;  %p646_p0 = scmp.ne.s32.totalorder %s941_s30, %s645_s25  ;;  %p1008_p5 = scmp.ne.s32.totalorder %s998_s22, 0 }
  0x5c   : > { %v270_v8 = vmax.f32 %v268_v5, %v269_v6  ;;  %v276_v9 = vrot.slane %v275_v7, 4  ;;  %v252_v22 = vsub.s32 0, %v249_v19  ;;  %v256_v25 = vsub.s32 1, %v249_v19  ;;  %vm262_vm6 = vmand %vm260_vm4, %vm261_vm5  ;;  %s737_s12 = smov [#allocation7]  }
  0x5d   : > { %p647_p7 = pnand %p646_p0, %p1008_p5  ;;  %s649_s3 = sshll.u32 %s737_s12, 4  ;;  %s650_s3 = int_to_ptr.vmem [resolvable:$false] %s649_s3 }
  0x5e   : > { %v271_v10 = vrot.slane %v270_v8, 2  ;;  %v277_v11 = vmax.f32 %v275_v7, %v276_v9  ;;  %v253_v26 = vrot.slane %v247_v24, %v252_v22  ;;  %v257_v27 = vrot.slane %v247_v24, %v256_v25  ;;  %s651_s7 = scalar_lea.vmem %s650_s3, 64  ;;  %p652_p10 = scmp.lt.s32.totalorder %s941_s30, %s650_s3 }
  0x5f   : > { %p648_p4 = pneg %p647_p7  ;;  %p653_p12 = scmp.lt.s32.totalorder %s651_s7, %s645_s25 }
  0x60   : > { %v272_v12 = vmax.f32 %v270_v8, %v271_v10  ;;  %v278_v13 = vrot.slane %v277_v11, 2  ;;  %vm258_vm2 = vcmp.eq.s32.totalorder %v249_v19, %v253_v26  ;;  %vm259_vm3 = vcmp.eq.s32.totalorder %v249_v19, %v257_v27 }
  0x61   : > { %v312_v28 = vsel %vm258_vm2, %v246_v3, 0.0  ;;  %v313_v32 = vsel %vm259_vm3, %v265_v4, 0.0  ;;  %v335_v4 = vunpack.c.0.s8 %v334_v59  ;;  %p654_p1 = por %p653_p12, %p652_p10 }
  0x62   : > { %v273_v14 = vrot.slane %v272_v12, 1  ;;  %v279_v15 = vmax.f32 %v277_v11, %v278_v13  ;;  %v314_v34 = vsel %vm267_vm1, %v312_v28, 0.0  ;;  %v321_v38 = vsel %vm267_vm1, %v313_v32, 0.0  ;;  %v263_v11 = vld [vmem:[%s921_s19] sm:$0x3] }
  0x63   : > { %v315_v39 = vrot.slane %v314_v34, 4  ;;  %v322_v42 = vrot.slane %v321_v38, 4  ;;  %v338_v8 = vsub.s32 %v335_v4, %v249_v19  ;;  %p655_p2 = pnand %p654_p1, %p648_p4 }
  0x64   : > { %v274_v16 = vmax.f32 %v272_v12, %v273_v14  ;;  %v280_v17 = vrot.slane %v279_v15, 1 }
  0x65   : > { %v316_v45 = vadd.f32 %v315_v39, %v314_v34  ;;  %v323_v48 = vadd.f32 %v322_v42, %v321_v38 }
  0x66   : > { %v281_v18 = vmax.f32 %v279_v15, %v280_v17 }
  0x67   : > { %v317_v51 = vrot.slane %v316_v45, 2  ;;  %v324_v53 = vrot.slane %v323_v48, 2 }
  0x68   : > { %v284_v20 = vcombine.low %v274_v16, %v281_v18 }
  0x69   : > { %v318_v54 = vadd.f32 %v317_v51, %v316_v45  ;;  %v325_v55 = vadd.f32 %v324_v53, %v323_v48 }
  0x6a   : > { %v286_v21 = vsub.f32 %v246_v3, %v284_v20 }
  0x6b   : > { %v319_v56 = vrot.slane %v318_v54, 1  ;;  %v326_v57 = vrot.slane %v325_v55, 1 }
  0x6c   : > { %v287_v23 = vmul.f32 1.442695, %v286_v21 }
  0x6d   : > { %v320_v62 = vadd.f32 %v319_v56, %v318_v54  ;;  %v327_v3 = vadd.f32 %v326_v57, %v325_v55 }
  0x6e   : > { %579 = vpow2.f32 %v287_v23 }
  0x78   : > { %v580_v29 = vpop.eup %579 }
  0x79   : > { %v290_v30 = vcombine.high %v580_v29, %v580_v29  ;;  %v292_v31 = vsel %vm267_vm1, %v580_v29, 0.0 }
  0x7a   : > { %v293_v33 = vrot.slane %v292_v31, 4 }
  0x7b   : > { %v299_v35 = vsel %vm267_vm1, %v290_v30, 0.0 }
  0x7c   : > { %v294_v36 = vadd.f32 %v293_v33, %v292_v31  ;;  %v300_v37 = vrot.slane %v299_v35, 4 }
  0x7e   : > { %v295_v40 = vrot.slane %v294_v36, 2  ;;  %v301_v41 = vadd.f32 %v300_v37, %v299_v35 }
  0x80   : > { %v296_v43 = vadd.f32 %v295_v40, %v294_v36  ;;  %v302_v44 = vrot.slane %v301_v41, 2 }
  0x82   : > { %v297_v46 = vrot.slane %v296_v43, 1  ;;  %v303_v47 = vadd.f32 %v302_v44, %v301_v41 }
  0x84   : > { %v298_v49 = vadd.f32 %v297_v46, %v296_v43  ;;  %v304_v50 = vrot.slane %v303_v47, 1 }
  0x86   : > { %v305_v52 = vadd.f32 %v304_v50, %v303_v47  ;;  %581 = vlog2.f32 %v298_v49 }
  0x88   : > { %583 = vlog2.f32 %v305_v52 }
  0x90   : > { %v582_v60 = vpop.eup %581 }
  0x91   : > { %v307_v61 = vmul.f32 0.6931472, %v582_v60 }
  0x92   : > { %v584_v63 = vpop.eup %583 }
  0x93   : > { %v309_v0 = vmul.f32 0.6931472, %v584_v63  ;;  %v310_v2 = vadd.f32 %v307_v61, %v274_v16 }
  0x95   : > { %v311_v5 = vadd.f32 %v309_v0, %v281_v18  ;;  %v328_v6 = vsub.f32 %v310_v2, %v320_v62 }
  0x97   : > { %v329_v7 = vsub.f32 %v311_v5, %v327_v3 }
  0x99   : > { %v332_v9 = vcombine.low %v328_v6, %v329_v7 }
  0x9b   : > { %v339_v10 = vrot.slane %v332_v9, %v338_v8 }
  0x9d   : > { %v346_v12 = vrot.slane %v339_v10, %v338_v8 }
  0x9f   : > { %v348_v13 = vsel %vm262_vm6, %v346_v12, 0.0 }
  0xa0   : > { %v349_v14 = vadd.f32 %v348_v13, %v263_v11 }
  0xa2   : > { %354 = vst.msk [vmem:[%s921_s19] sm:$0x3] %vm917_vm0, %v349_v14 }
  0xa3   : > { %658 = shalt.err (!%p655_p2)
}
  0xa4   : > { %s659_s8 = scalar_lea.hbm %s939_s27, 32  ;;  %s663_s4 = scalar_lea.hbm %s993_s2, 64 }
  0xa5   : > { %p660_p9 = scmp.ne.s32.totalorder %s939_s27, %s659_s8  ;;  %p664_p6 = scmp.lt.u32.totalorder %s939_s27, %s993_s2 }
  0xa6   : > { %p665_p13 = scmp.lt.u32.totalorder %s663_s4, %s659_s8  ;;  %p667_p0 = scmp.lt.u32.totalorder %s659_s8, %s939_s27 }
  0xa7   : > { %p661_p11 = pnand %p660_p9, %p1008_p5 }
  0xa8   : > { %p666_p8 = por %p665_p13, %p664_p6 }
  0xa9   : > { %p662_p3 = pneg %p661_p11 }
  0xaa   : > { %p668_p7 = por %p667_p0, %p666_p8 }
  0xac   : > { %p669_p4 = pnand %p668_p7, %p662_p3 }
  0xae   : > { %672 = shalt.err (!%p669_p4)
}
  0xaf   : > { %513 = dma.vmem_to_hbm [thread:$0]  (%p1008_p5), %s941_s30, 32, %s939_s27, %s356_s28  }
  0xb0 PF: > { %s384_s29 = sand.u32 1, %s711_s9   ;;  %p1009_p10 = scmp.ne.s32.totalorder %s999_s24, 0 }
  0xb1   : > { %p1010_p12 = scmp.ge.s32.totalorder %s731_s14, 2  ;;  %s385_s16 = scalar_lea.sflag [#allocation4], %s384_s29 }
  0xb3   : > { %p523_p1 = pnand %p1010_p12, %p1009_p10 }
  0xb5   : > { %706 = dma.done.wait (!%p523_p1), %s385_s16, 32  }
  0xb6   : > { %708 = vsyncadd (!%p523_p1), %s385_s16, 4294967264  ;;  %s21_s14 = sadd.s32 1, %s731_s14   ;;  %s1011_s9 = smov %s715_s10 }
  0xb7   : > { %p18_p2 = scmp.ge.s32.totalorder %s21_s14, 4   ;;  %s1012_s10 = smov %s719_s11 }
  0xb8   : > { %s1013_s11 = smov %s809_s23  ;;  %s1014_s12 = smov %s727_s13 }
  0xb9   : > { %s1015_s13 = smov %s1017_s17  ;;  %20 = sbr.rel (!%p18_p2) target bundleno = 8 (0x8), region = 90 }
  0xc0   :  { %390 = vsyncpa [#allocation3], 1 }
  0xc1   :  { %392 = vsyncpa [#allocation3 + $0x1], 1 }
  0xc2   :  { %393 = vsyncpa [#allocation6], 1 }
  0xc3   :  { %395 = vsyncpa [#allocation6 + $0x1], 1 }
  0xc4   :  { %396 = vsyncpa [#allocation4], 1 }
  0xc5   :  { %398 = vsyncpa [#allocation4 + $0x1], 1 }

</bundles_post_ra>
